<compile_context>
chip_gen: v5e
topology: v5e:2x2
jax: 0.10.0
libtpu: 0.0.40
codegen_flags: <defaults>
</compile_context>

<pallas_src>
import jax
import jax.numpy as jnp
from jax.experimental import pallas as pl
from jax.experimental.pallas import tpu as pltpu


def _gater_kernel(x_ref, emb_ref, o_ref):
    # x_ref / o_ref: (b_tile, s_tile, D) VMEM tiles; emb_ref: (1, D) resident tile.
    x = x_ref[...]                                    # (b_tile, s_tile, D)
    gated = jnp.tanh(x) * emb_ref[...][None, :, :]    # broadcast (1,1,D)
    o_ref[...] = gated.astype(o_ref.dtype)

    # Structural passthrough for sequence position 0: only the tiles whose
    # sequence range starts at 0 contain that row, so gate the one-row
    # overwrite with pl.when instead of a full-tile iota + where.
    @pl.when(pl.program_id(1) == 0)
    def _():
        o_ref[:, 0:1, :] = x[:, 0:1, :]


def _choose_tiles(B, S, D, itemsize):
    """Pick (b_tile, s_tile) so one block is ~<=6 MiB (v7x-safe) and ~512 rows."""
    row_bytes = max(1, D * itemsize)
    budget_rows = max(8, (6 * 1024 * 1024) // row_bytes)
    target_rows = min(512, budget_rows)
    if S <= target_rows:
        s_tile = S                                    # full seq dim (always legal)
        b_tile = max(1, min(B, target_rows // max(1, S)))
    else:
        s_tile = max(8, (target_rows // 8) * 8)       # keep sublane-aligned
        b_tile = 1
    return b_tile, s_tile


def embedding_gater(x, embedding, *, b_tile=None, s_tile=None):
    """x: [B, S, D] float, embedding: [D] float -> [B, S, D] (x.dtype)."""
    B, S, D = x.shape
    itemsize = jnp.dtype(x.dtype).itemsize
    auto_b, auto_s = _choose_tiles(B, S, D, itemsize)
    b_tile = auto_b if b_tile is None else max(1, min(b_tile, B))
    s_tile = auto_s if s_tile is None else max(1, min(s_tile, S))

    emb2d = embedding.astype(x.dtype).reshape(1, D)
    grid = (pl.cdiv(B, b_tile), pl.cdiv(S, s_tile))

    # Advisory cost for XLA scheduling: pure streaming, one tanh per element.
    cost = pl.CostEstimate(
        flops=2 * B * S * D,
        transcendentals=B * S * D,
        bytes_accessed=(2 * B * S * D + D) * itemsize,
    )

    return pl.pallas_call(
        _gater_kernel,
        out_shape=jax.ShapeDtypeStruct((B, S, D), x.dtype),
        grid_spec=pltpu.PrefetchScalarGridSpec(
            num_scalar_prefetch=0,
            grid=grid,
            in_specs=[
                pl.BlockSpec((b_tile, s_tile, D), lambda bi, si: (bi, si, 0)),
                # Constant block index -> fetched once, stays resident in VMEM.
                pl.BlockSpec((1, D), lambda bi, si: (0, 0)),
            ],
            out_specs=pl.BlockSpec((b_tile, s_tile, D), lambda bi, si: (bi, si, 0)),
        ),
        compiler_params=pltpu.CompilerParams(
            dimension_semantics=("parallel", "parallel"),
        ),
        cost_estimate=cost,
    )(x, emb2d)


def embedding_gater_ref(x, embedding):
    y = jnp.tanh(x) * embedding
    return y.at[:, 0, :].set(x[:, 0, :])


if __name__ == "__main__":
    key = jax.random.PRNGKey(0)
    kx, ke, kx2, ke2 = jax.random.split(key, 4)

    # Small shape implied by the module: (batch, seq, dim).
    B, S, D = 2, 8, 32
    x = jax.random.normal(kx, (B, S, D), dtype=jnp.float32)
    # Deterministic stand-in for nn.Parameter(torch.empty(dim).uniform_(-1, 1)).
    embedding = jax.random.uniform(ke, (D,), dtype=jnp.float32, minval=-1.0, maxval=1.0)

    out = jax.block_until_ready(embedding_gater(x, embedding))
    ref = embedding_gater_ref(x, embedding)
    assert out.shape == (B, S, D)
    assert jnp.allclose(out, ref, atol=1e-5, rtol=1e-5), "mismatch vs reference (small)"

    # Exercise the multi-step tiled grid path (forced small tiles, lane-dense D=128).
    B2, S2, D2 = 4, 64, 128
    x2 = jax.random.normal(kx2, (B2, S2, D2), dtype=jnp.float32)
    emb2 = jax.random.uniform(ke2, (D2,), dtype=jnp.float32, minval=-1.0, maxval=1.0)
    out2 = jax.block_until_ready(embedding_gater(x2, emb2, b_tile=1, s_tile=8))
    ref2 = embedding_gater_ref(x2, emb2)
    assert jnp.allclose(out2, ref2, atol=1e-5, rtol=1e-5), "mismatch vs reference (tiled)"

    print("KERNEL_OK")
</pallas_src>

<mosaic_0001>
module attributes {stable_mosaic.version = 11 : i64} {
  func.func @_gater_kernel(%arg0: i32, %arg1: i32, %arg2: memref<2x8x32xf32, #tpu.memory_space<vmem>>, %arg3: memref<1x32xf32, #tpu.memory_space<vmem>>, %arg4: memref<2x8x32xf32, #tpu.memory_space<vmem>>) attributes {dimension_semantics = [#tpu.dimension_semantics<parallel>, #tpu.dimension_semantics<parallel>], iteration_bounds = array<i64: 1, 1>, scalar_prefetch = 0 : i64, scratch_operands = 0 : i64, tpu.core_type = #tpu.core_type<tc>, window_params = [{transform_indices = @transform_0, window_bounds = array<i64: 2, 8, 32>}, {pipeline_mode = #tpu.pipeline_mode<synchronous>, transform_indices = @transform_1, window_bounds = array<i64: 1, 32>}, {transform_indices = @transform_2, window_bounds = array<i64: 2, 8, 32>}]} {
    %c0 = arith.constant 0 : index
    %c0_0 = arith.constant 0 : index
    %c0_1 = arith.constant 0 : index
    %0 = vector.load %arg2[%c0, %c0_0, %c0_1] : memref<2x8x32xf32, #tpu.memory_space<vmem>>, vector<2x8x32xf32>
    %1 = math.tanh %0 : vector<2x8x32xf32>
    %c0_2 = arith.constant 0 : index
    %c0_3 = arith.constant 0 : index
    %2 = vector.load %arg3[%c0_2, %c0_3] : memref<1x32xf32, #tpu.memory_space<vmem>>, vector<1x32xf32>
    %3 = vector.shape_cast %2 : vector<1x32xf32> to vector<1x1x32xf32>
    %4 = vector.broadcast %3 : vector<1x1x32xf32> to vector<2x8x32xf32>
    %5 = arith.mulf %1, %4 : vector<2x8x32xf32>
    %c0_4 = arith.constant 0 : index
    %c0_5 = arith.constant 0 : index
    %c0_6 = arith.constant 0 : index
    %6 = vector.load %arg4[%c0_4, %c0_5, %c0_6] : memref<2x8x32xf32, #tpu.memory_space<vmem>>, vector<2x8x32xf32>
    tpu.vector_store %arg4[%c0_4, %c0_5, %c0_6], %5 {strides = array<i32>} : memref<2x8x32xf32, #tpu.memory_space<vmem>>, vector<2x8x32xf32>,
    %c0_i32 = arith.constant 0 : i32
    %7 = arith.cmpi eq, %arg1, %c0_i32 : i32
    %8 = arith.extui %7 : i1 to i32
    %c0_i32_7 = arith.constant 0 : i32
    %9 = arith.cmpi ne, %8, %c0_i32_7 : i32
    scf.if %9 {
      %10 = vector.extract_strided_slice %0 {offsets = [0, 0, 0], sizes = [2, 1, 32], strides = [1, 1, 1]} : vector<2x8x32xf32> to vector<2x1x32xf32>
      %c0_8 = arith.constant 0 : index
      %c0_9 = arith.constant 0 : index
      %c0_10 = arith.constant 0 : index
      %11 = vector.load %arg4[%c0_8, %c0_9, %c0_10] : memref<2x8x32xf32, #tpu.memory_space<vmem>>, vector<2x1x32xf32>
      tpu.vector_store %arg4[%c0_8, %c0_9, %c0_10], %10 {strides = array<i32>} : memref<2x8x32xf32, #tpu.memory_space<vmem>>, vector<2x1x32xf32>,
    } else {
    }
    return
  }
  func.func @transform_0(%arg0: i32, %arg1: i32) -> (i32, i32, i32) {
    %c0_i32 = arith.constant 0 : i32
    %c0_i32_0 = arith.constant 0 : i32
    return %arg0, %arg1, %c0_i32 : i32, i32, i32
  }
  func.func @transform_1(%arg0: i32, %arg1: i32) -> (i32, i32) {
    %c0_i32 = arith.constant 0 : i32
    %c0_i32_0 = arith.constant 0 : i32
    %c0_i32_1 = arith.constant 0 : i32
    return %c0_i32, %c0_i32_0 : i32, i32
  }
  func.func @transform_2(%arg0: i32, %arg1: i32) -> (i32, i32, i32) {
    %c0_i32 = arith.constant 0 : i32
    %c0_i32_0 = arith.constant 0 : i32
    return %arg0, %arg1, %c0_i32 : i32, i32, i32
  }
}

</mosaic_0001>

<bundles_post_ra>
// kernel: tpu_custom_call.1
= control target key start
LH: loop header
LB: loop body
LE: loop exit
PB: predicated region body
PF: predicated region fallthrough
CT: control target
= control target key end

     0   :  { %7 = vsyncpa [#allocation3], 0  ;;  %s205_s0 = inlined_call_operand.hbm [shape: f32[2,8,32], index: 0, kind: input, shape index: {}]   ;;  %s206_s1 = inlined_call_operand.hbm [shape: f32[1,32], index: 1, kind: input, shape index: {}]   ;;  %s207_s2 = inlined_call_operand.hbm [shape: f32[2,8,32], index: 2, kind: output, shape index: {}]  }
   0x1   :  { %8 = vsyncpa [#allocation6], 0 }
   0x2   :  { %9 = vsyncpa [#allocation4], 0  ;;  %s14_s11 = sshll.u32 %s205_s0, 4  ;;  %s170_s12 = smov [#allocation2]   ;;  %s15_s11 = int_to_ptr.hbm [resolvable:$true] %s14_s11 }
   0x3   :  { %s16_s13 = sshll.u32 %s170_s12, 4  ;;  %s28_s16 = sshll.u32 %s206_s1, 4  ;;  %s17_s13 = int_to_ptr.vmem [resolvable:$true] %s16_s13  ;;  %s29_s16 = int_to_ptr.hbm [resolvable:$true] %s28_s16 }
   0x4   :  { %s171_s17 = smov 128   ;;  %s172_s18 = smov 8  }
   0x5   :  { %22 = dma.hbm_to_vmem [thread:$0]  %s15_s11, 256, %s17_s13, [#allocation3], %s171_s17, %s171_s17, %s172_s18  }
   0x6   :  { %s173_s19 = smov [#allocation5]  }
   0x7   :  { %s30_s20 = sshll.u32 %s173_s19, 4  ;;  %s31_s20 = int_to_ptr.vmem [resolvable:$true] %s30_s20 }
   0x8   :  { %33 = dma.hbm_to_vmem [thread:$0]  %s29_s16, 16, %s31_s20, [#allocation6]  }
   0x9   :  { %164 = dma.done.wait [#allocation3], 256  }
   0xa   :  { %165 = vsyncadd [#allocation3], 4294967040 }
   0xb   :  { %166 = dma.done.wait [#allocation6], 16  }
   0xc   :  { %167 = vsyncadd [#allocation6], 4294967280  ;;  %v42_v0 = vld [vmem:[#allocation2] sm:$0xff]  ;;  %v43_v1 = vld [vmem:[#allocation2 + $0x8] sm:$0xff]  ;;  %vm52_vm0 = vcmask 261120   ;;  %s174_s0 = smov [#allocation7]  }
   0xd   :  { %88 = vtanh.f32 %v42_v0  ;;  %v87_v2 = vld [vmem:[#allocation5] ss:$0 sm:$0xff]  ;;  %s66_s1 = sshll.u32 %s174_s0, 4  ;;  %s68_s23 = sshll.u32 %s207_s2, 4  ;;  %vm59_vm1 = vcmask 253952   ;;  %s67_s1 = int_to_ptr.vmem [resolvable:$true] %s66_s1  ;;  %s69_s23 = int_to_ptr.hbm [resolvable:$true] %s68_s23 }
   0xe   :  { %90 = vtanh.f32 %v43_v1 }
  0x13   :  { %v89_v3 = vpop.eup %88 }
  0x14   :  { %v91_v4 = vpop.eup %90  ;;  %v50_v5 = vmul.f32 %v89_v3, %v87_v2 }
  0x15   :  { %v51_v6 = vmul.f32 %v91_v4, %v87_v2 }
  0x16   :  { %53 = vst.msk [vmem:[#allocation7] sm:$0xff] %vm52_vm0, %v50_v5 }
  0x17   :  { %54 = vst.msk [vmem:[#allocation7 + $0x8] sm:$0xff] %vm52_vm0, %v51_v6 }
  0x18   :  { %60 = vst.msk [vmem:[#allocation7] sm:$0x1] %vm59_vm1, %v42_v0 }
  0x19   :  { %61 = vst.msk [vmem:[#allocation7 + $0x8] sm:$0x1] %vm59_vm1, %v43_v1 }
  0x1a   :  { %74 = dma.vmem_to_hbm [thread:$0]  %s67_s1, 256, %s69_s23, [#allocation4], %s171_s17, %s171_s17, %s172_s18  }
  0x1b   :  { %168 = dma.done.wait [#allocation4], 256  }
  0x1c   :  { %169 = vsyncadd [#allocation4], 4294967040 }
  0x1d   :  { %79 = vsyncpa [#allocation3], 1 }
  0x1e   :  { %80 = vsyncpa [#allocation6], 1 }
  0x1f   :  { %81 = vsyncpa [#allocation4], 1 }

</bundles_post_ra>
